<compile_context>
chip_gen: v7x
topology: tpu7x:2x2x1
jax: 0.10.0
libtpu: 0.0.40
codegen_flags: <defaults>
</compile_context>

<pallas_src>
import functools

import jax
import jax.numpy as jnp
from jax.experimental import pallas as pl
from jax.experimental.pallas import tpu as pltpu


def _round_up(n: int, m: int) -> int:
    return ((n + m - 1) // m) * m


def _vmem_capacity_bytes(default: int = 64 << 20) -> int:
    """Physical per-TensorCore VMEM; conservative 64 MiB fallback."""
    try:
        return int(pltpu.get_tpu_info().vmem_capacity_bytes)
    except Exception:  # pragma: no cover - info query unavailable
        return default


def _default_tm() -> int:
    """Per-generation row-tile default (review items: v5e=128, v6e=512)."""
    try:
        kind = jax.devices()[0].device_kind.lower()
    except Exception:  # pragma: no cover
        kind = ""
    if "v5 lite" in kind or "v5e" in kind or "v5lite" in kind:
        return 128   # 4x128x128 MXU already filled; smaller f32 h -> less spill
    if "v6" in kind:
        return 512   # 128 MiB VMEM; big tiles amortize the ~0.35us/step overhead
    return 256       # v7x (64 MiB/TC) and anything else


def _gelu(h, approximate):
    if approximate:
        # tanh approximation: runs on the EUP slot instead of the long erf VALU
        # polynomial. Slightly different numerics from torch.nn.GELU() default.
        c = jnp.float32(0.7978845608028654)  # sqrt(2/pi)
        return 0.5 * h * (1.0 + jnp.tanh(c * (h + jnp.float32(0.044715) * h * h * h)))
    inv_sqrt2 = jnp.float32(0.7071067811865476)
    return 0.5 * h * (1.0 + jax.lax.erf(h * inv_sqrt2))


def _kernel_resident(x_ref, w1_ref, b1_ref, w2_ref, b2_ref, o_ref, *, approx_gelu):
    # Both dots consume matching (native/compute) dtypes and accumulate in f32.
    h = jnp.dot(x_ref[...], w1_ref[...], preferred_element_type=jnp.float32)
    h = h + b1_ref[...]                       # b1 is f32
    h = _gelu(h, approx_gelu)
    y = jnp.dot(h.astype(w2_ref.dtype), w2_ref[...],
                preferred_element_type=jnp.float32)
    o_ref[...] = (y + b2_ref[...]).astype(o_ref.dtype)


def _kernel_chunked(x_ref, w1_ref, b1_ref, w2_ref, b2_ref, o_ref, acc_ref, *, approx_gelu):
    # Hidden dim chunked along grid axis 1 (reduction axis of the 2nd matmul).
    k = pl.program_id(1)

    @pl.when(k == 0)
    def _():
        acc_ref[...] = jnp.zeros_like(acc_ref)

    h = jnp.dot(x_ref[...], w1_ref[...], preferred_element_type=jnp.float32)
    h = h + b1_ref[...]
    h = _gelu(h, approx_gelu)
    acc_ref[...] += jnp.dot(h.astype(w2_ref.dtype), w2_ref[...],
                            preferred_element_type=jnp.float32)

    @pl.when(k == pl.num_programs(1) - 1)
    def _():
        o_ref[...] = (acc_ref[...] + b2_ref[...]).astype(o_ref.dtype)


def _wspec(shape, index_map, mode):
    """BlockSpec for a grid-invariant operand; single-buffered when supported."""
    if mode is None:
        return pl.BlockSpec(shape, index_map)
    return pl.BlockSpec(shape, index_map, pipeline_mode=mode)


def image_adapter_forward(vision_outputs, w1, b1, w2, b2, *,
                          tm=None, tk=None, compute_dtype=None,
                          approximate_gelu=False, force_k_chunking=False):
    """Fused ImageAdapter forward.

    vision_outputs: (B, S, D_in)
    w1: (D_in, D_out)   b1: (D_out,)        (torch Linear weights transposed)
    w2: (D_out, D_out)  b2: (D_out,)
    compute_dtype: optional MXU dtype (e.g. jnp.bfloat16 on v6e/v7x); f32 accum kept.
    """
    B, S, D_in = vision_outputs.shape
    D_out = w1.shape[1]
    M = B * S
    out_dtype = vision_outputs.dtype
    cdt = jnp.dtype(compute_dtype) if compute_dtype is not None else jnp.dtype(out_dtype)

    if tm is None:
        tm = _default_tm()
    tm_eff = max(8, min(_round_up(tm, 8), _round_up(M, 8)))
    m_tiles = pl.cdiv(M, tm_eff)              # ragged last block handled by Pallas

    d_in_p = _round_up(D_in, 128)             # lane-dense MXU / store tiles
    d_out_p = _round_up(D_out, 128)

    x_bytes = jnp.dtype(cdt).itemsize
    w_bytes = jnp.dtype(cdt).itemsize
    o_bytes = jnp.dtype(out_dtype).itemsize

    # Per-TensorCore budget: megacore shards M across cores and each core holds
    # its own weight copy, so size against a single core's VMEM minus headroom.
    vmem_cap = _vmem_capacity_bytes()
    vmem_cap_limit = max(32 << 20, vmem_cap - (8 << 20))   # ~56 MiB on v7x, ~120 MiB on v5e/v6e
    budget = int(0.85 * vmem_cap_limit)

    def resident_bytes(tm_):
        return (2 * tm_ * d_in_p * x_bytes                 # x tiles (double-buffered)
                + 2 * tm_ * d_out_p * o_bytes              # out tiles (double-buffered)
                + (d_in_p + d_out_p) * d_out_p * w_bytes   # W1 + W2 (single-buffered)
                + 2 * d_out_p * 4                          # biases (f32)
                + tm_ * d_out_p * 4)                       # f32 intermediate h

    use_chunked = force_k_chunking or resident_bytes(tm_eff) > budget

    if use_chunked:
        def chunk_bytes(tm_, tk_):
            return (2 * tm_ * d_in_p * x_bytes
                    + 2 * tm_ * d_out_p * o_bytes
                    + 2 * (d_in_p + d_out_p) * tk_ * w_bytes   # W1/W2 chunks (double-buffered)
                    + 2 * tk_ * 4 + d_out_p * 4                # b1 chunks + b2
                    + tm_ * d_out_p * 4)                       # f32 accumulator scratch
        if tk is None:
            tk = d_out_p
            while tk > 128 and chunk_bytes(tm_eff, tk) > budget:
                tk = max(128, _round_up(tk // 2, 128))
            while tm_eff > 8 and chunk_bytes(tm_eff, tk) > budget:
                tm_eff = max(8, _round_up(tm_eff // 2, 8))
            m_tiles = pl.cdiv(M, tm_eff)
        else:
            tk = max(128, _round_up(tk, 128))
        d_hid_p = _round_up(D_out, tk)        # hidden axis padded to a multiple of tk
        k_tiles = d_hid_p // tk
        vmem_need = chunk_bytes(tm_eff, tk)
    else:
        tk = d_out_p
        d_hid_p = d_out_p
        k_tiles = 1
        vmem_need = resident_bytes(tm_eff)

    # --- operand prep (feature-axis zero padding is exact; no M padding) -----
    x2d = vision_outputs.reshape(M, D_in)
    if x2d.dtype != cdt:
        x2d = x2d.astype(cdt)
    if d_in_p != D_in:
        x2d = jnp.pad(x2d, ((0, 0), (0, d_in_p - D_in)))

    w1_p = w1 if w1.dtype == cdt else w1.astype(cdt)
    w2_p = w2 if w2.dtype == cdt else w2.astype(cdt)
    if (d_in_p, d_hid_p) != (D_in, D_out):
        w1_p = jnp.pad(w1_p, ((0, d_in_p - D_in), (0, d_hid_p - D_out)))
    if (d_hid_p, d_out_p) != (D_out, D_out):
        w2_p = jnp.pad(w2_p, ((0, d_hid_p - D_out), (0, d_out_p - D_out)))

    b1_p = b1.astype(jnp.float32)
    if d_hid_p != D_out:
        b1_p = jnp.pad(b1_p, (0, d_hid_p - D_out))
    b2_p = b2.astype(jnp.float32)
    if d_out_p != D_out:
        b2_p = jnp.pad(b2_p, (0, d_out_p - D_out))
    b1_p = b1_p.reshape(1, d_hid_p)
    b2_p = b2_p.reshape(1, d_out_p)

    # Advisory cost estimate for XLA's scheduler.
    cost = pl.CostEstimate(
        flops=2 * M * d_hid_p * (d_in_p + d_out_p),
        transcendentals=M * d_hid_p,
        bytes_accessed=(M * d_in_p * x_bytes
                        + (d_in_p + d_out_p) * d_hid_p * w_bytes
                        + (d_hid_p + d_out_p) * 4
                        + M * d_out_p * o_bytes))

    vmem_limit = int(min(max(vmem_need + (4 << 20), 32 << 20), vmem_cap_limit))
    out_shape = jax.ShapeDtypeStruct((M, d_out_p), out_dtype)

    def _call(const_mode):
        if use_chunked:
            kernel = functools.partial(_kernel_chunked, approx_gelu=approximate_gelu)
            grid = (m_tiles, k_tiles)
            in_specs = [
                pl.BlockSpec((tm_eff, d_in_p), lambda i, k: (i, 0)),       # x tile
                pl.BlockSpec((d_in_p, tk), lambda i, k: (0, k)),           # W1 chunk
                pl.BlockSpec((1, tk), lambda i, k: (0, k)),                # b1 chunk
                pl.BlockSpec((tk, d_out_p), lambda i, k: (k, 0)),          # W2 chunk
                _wspec((1, d_out_p), lambda i, k: (0, 0), const_mode),     # b2 (invariant)
            ]
            out_specs = pl.BlockSpec((tm_eff, d_out_p), lambda i, k: (i, 0))
            scratch = [pltpu.VMEM((tm_eff, d_out_p), jnp.float32)]
            dims = ("parallel", "arbitrary")
        else:
            kernel = functools.partial(_kernel_resident, approx_gelu=approximate_gelu)
            grid = (m_tiles,)
            in_specs = [
                pl.BlockSpec((tm_eff, d_in_p), lambda i: (i, 0)),          # x tile
                _wspec((d_in_p, d_hid_p), lambda i: (0, 0), const_mode),   # W1 (resident)
                _wspec((1, d_hid_p), lambda i: (0, 0), const_mode),        # b1
                _wspec((d_hid_p, d_out_p), lambda i: (0, 0), const_mode),  # W2 (resident)
                _wspec((1, d_out_p), lambda i: (0, 0), const_mode),        # b2
            ]
            out_specs = pl.BlockSpec((tm_eff, d_out_p), lambda i: (i, 0))
            scratch = []
            dims = ("parallel",)
        return pl.pallas_call(
            kernel,
            out_shape=out_shape,
            grid=grid,
            in_specs=in_specs,
            out_specs=out_specs,
            scratch_shapes=scratch,
            compiler_params=pltpu.CompilerParams(
                dimension_semantics=dims,
                vmem_limit_bytes=vmem_limit,
            ),
            cost_estimate=cost,
        )(x2d, w1_p, b1_p, w2_p, b2_p)

    try:
        # Grid-invariant operands only need one VMEM buffer (halves weight VMEM).
        out2d = _call(pl.Buffered(1))
    except Exception:  # pragma: no cover - fallback if buffer_count=1 is rejected
        out2d = _call(None)

    if d_out_p != D_out:
        out2d = out2d[:, :D_out]
    return out2d.reshape(B, S, D_out)


def _reference(vision_outputs, w1, b1, w2, b2):
    x = vision_outputs.astype(jnp.float32)
    h = x @ w1.astype(jnp.float32) + b1.astype(jnp.float32)
    h = 0.5 * h * (1.0 + jax.lax.erf(h * jnp.float32(0.7071067811865476)))
    y = h @ w2.astype(jnp.float32) + b2.astype(jnp.float32)
    return y.astype(vision_outputs.dtype)


if __name__ == "__main__":
    key = jax.random.PRNGKey(0)

    # Test 1: module-consistent small shapes, default resident-weight path.
    B, S, D_in, D_out = 2, 8, 32, 32
    k_x, k_w1, k_b1, k_w2, k_b2, key = jax.random.split(key, 6)
    x = jax.random.normal(k_x, (B, S, D_in), dtype=jnp.float32)
    w1 = jax.random.normal(k_w1, (D_in, D_out), dtype=jnp.float32) * 0.02
    b1 = jax.random.normal(k_b1, (D_out,), dtype=jnp.float32) * 0.01
    w2 = jax.random.normal(k_w2, (D_out, D_out), dtype=jnp.float32) * 0.02
    b2 = jax.random.normal(k_b2, (D_out,), dtype=jnp.float32) * 0.01

    out = jax.block_until_ready(image_adapter_forward(x, w1, b1, w2, b2))
    ref = _reference(x, w1, b1, w2, b2)
    assert out.shape == (B, S, D_out)
    assert jnp.allclose(out, ref, atol=1e-5, rtol=1e-5), "resident path mismatch"

    # Test 2: ragged M + forced K-chunked accumulator path (large-adapter / v7x plan).
    B2, S2, D_in2, D_out2 = 2, 5, 32, 256
    k_x, k_w1, k_b1, k_w2, k_b2, key = jax.random.split(key, 6)
    x2 = jax.random.normal(k_x, (B2, S2, D_in2), dtype=jnp.float32)
    w1b = jax.random.normal(k_w1, (D_in2, D_out2), dtype=jnp.float32) * 0.02
    b1b = jax.random.normal(k_b1, (D_out2,), dtype=jnp.float32) * 0.01
    w2b = jax.random.normal(k_w2, (D_out2, D_out2), dtype=jnp.float32) * 0.02
    b2b = jax.random.normal(k_b2, (D_out2,), dtype=jnp.float32) * 0.01

    out2 = jax.block_until_ready(
        image_adapter_forward(x2, w1b, b1b, w2b, b2b,
                              tm=8, tk=128, force_k_chunking=True))
    ref2 = _reference(x2, w1b, b1b, w2b, b2b)
    assert out2.shape == (B2, S2, D_out2)
    assert jnp.allclose(out2, ref2, atol=1e-4, rtol=1e-4), "chunked path mismatch"

    print("KERNEL_OK")
</pallas_src>

<mosaic_0001>
module attributes {stable_mosaic.version = 11 : i64} {
  func.func @_kernel_resident(%arg0: i32, %arg1: memref<16x128xf32, #tpu.memory_space<vmem>>, %arg2: memref<128x128xf32, #tpu.memory_space<vmem>>, %arg3: memref<1x128xf32, #tpu.memory_space<vmem>>, %arg4: memref<128x128xf32, #tpu.memory_space<vmem>>, %arg5: memref<1x128xf32, #tpu.memory_space<vmem>>, %arg6: memref<16x128xf32, #tpu.memory_space<vmem>>) attributes {dimension_semantics = [#tpu.dimension_semantics<parallel>], iteration_bounds = array<i64: 1>, scalar_prefetch = 0 : i64, scratch_operands = 0 : i64, tpu.core_type = #tpu.core_type<tc>, window_params = [{transform_indices = @transform_0, window_bounds = array<i64: 16, 128>}, {pipeline_mode = #tpu.pipeline_mode<synchronous>, transform_indices = @transform_1, window_bounds = array<i64: 128, 128>}, {pipeline_mode = #tpu.pipeline_mode<synchronous>, transform_indices = @transform_2, window_bounds = array<i64: 1, 128>}, {pipeline_mode = #tpu.pipeline_mode<synchronous>, transform_indices = @transform_3, window_bounds = array<i64: 128, 128>}, {pipeline_mode = #tpu.pipeline_mode<synchronous>, transform_indices = @transform_4, window_bounds = array<i64: 1, 128>}, {transform_indices = @transform_5, window_bounds = array<i64: 16, 128>}]} {
    %c0 = arith.constant 0 : index
    %c0_0 = arith.constant 0 : index
    %0 = vector.load %arg1[%c0, %c0_0] : memref<16x128xf32, #tpu.memory_space<vmem>>, vector<16x128xf32>
    %c0_1 = arith.constant 0 : index
    %c0_2 = arith.constant 0 : index
    %1 = vector.load %arg2[%c0_1, %c0_2] : memref<128x128xf32, #tpu.memory_space<vmem>>, vector<128x128xf32>
    %cst = arith.constant dense<0.000000e+00> : vector<16x128xf32>
    %2 = tpu.matmul %0, %1, %cst {dimension_numbers = #tpu.dot_dimension_numbers<[1], [0], [0], [1], [0, 0, 1, 1], [], []>} : vector<16x128xf32>, vector<128x128xf32>, vector<16x128xf32> -> vector<16x128xf32>
    %c0_3 = arith.constant 0 : index
    %c0_4 = arith.constant 0 : index
    %3 = vector.load %arg3[%c0_3, %c0_4] : memref<1x128xf32, #tpu.memory_space<vmem>>, vector<1x128xf32>
    %4 = vector.broadcast %3 : vector<1x128xf32> to vector<16x128xf32>
    %5 = arith.addf %2, %4 : vector<16x128xf32>
    %cst_5 = arith.constant 5.000000e-01 : f32
    %6 = vector.broadcast %cst_5 : f32 to vector<16x128xf32>
    %7 = arith.mulf %6, %5 : vector<16x128xf32>
    %cst_6 = arith.constant 0.707106769 : f32
    %8 = vector.broadcast %cst_6 : f32 to vector<16x128xf32>
    %9 = arith.mulf %5, %8 : vector<16x128xf32>
    %10 = math.erf %9 : vector<16x128xf32>
    %cst_7 = arith.constant 1.000000e+00 : f32
    %11 = vector.broadcast %cst_7 : f32 to vector<16x128xf32>
    %12 = arith.addf %11, %10 : vector<16x128xf32>
    %13 = arith.mulf %7, %12 : vector<16x128xf32>
    %c0_8 = arith.constant 0 : index
    %c0_9 = arith.constant 0 : index
    %14 = vector.load %arg4[%c0_8, %c0_9] : memref<128x128xf32, #tpu.memory_space<vmem>>, vector<128x128xf32>
    %cst_10 = arith.constant dense<0.000000e+00> : vector<16x128xf32>
    %15 = tpu.matmul %13, %14, %cst_10 {dimension_numbers = #tpu.dot_dimension_numbers<[1], [0], [0], [1], [0, 0, 1, 1], [], []>} : vector<16x128xf32>, vector<128x128xf32>, vector<16x128xf32> -> vector<16x128xf32>
    %c0_11 = arith.constant 0 : index
    %c0_12 = arith.constant 0 : index
    %16 = vector.load %arg5[%c0_11, %c0_12] : memref<1x128xf32, #tpu.memory_space<vmem>>, vector<1x128xf32>
    %17 = vector.broadcast %16 : vector<1x128xf32> to vector<16x128xf32>
    %18 = arith.addf %15, %17 : vector<16x128xf32>
    %c0_13 = arith.constant 0 : index
    %c0_14 = arith.constant 0 : index
    %19 = vector.load %arg6[%c0_13, %c0_14] : memref<16x128xf32, #tpu.memory_space<vmem>>, vector<16x128xf32>
    tpu.vector_store %arg6[%c0_13, %c0_14], %18 {strides = array<i32>} : memref<16x128xf32, #tpu.memory_space<vmem>>, vector<16x128xf32>,
    return
  }
  func.func @transform_0(%arg0: i32) -> (i32, i32) {
    %c0_i32 = arith.constant 0 : i32
    %c0_i32_0 = arith.constant 0 : i32
    return %arg0, %c0_i32 : i32, i32
  }
  func.func @transform_1(%arg0: i32) -> (i32, i32) {
    %c0_i32 = arith.constant 0 : i32
    %c0_i32_0 = arith.constant 0 : i32
    %c0_i32_1 = arith.constant 0 : i32
    return %c0_i32, %c0_i32_0 : i32, i32
  }
  func.func @transform_2(%arg0: i32) -> (i32, i32) {
    %c0_i32 = arith.constant 0 : i32
    %c0_i32_0 = arith.constant 0 : i32
    %c0_i32_1 = arith.constant 0 : i32
    return %c0_i32, %c0_i32_0 : i32, i32
  }
  func.func @transform_3(%arg0: i32) -> (i32, i32) {
    %c0_i32 = arith.constant 0 : i32
    %c0_i32_0 = arith.constant 0 : i32
    %c0_i32_1 = arith.constant 0 : i32
    return %c0_i32, %c0_i32_0 : i32, i32
  }
  func.func @transform_4(%arg0: i32) -> (i32, i32) {
    %c0_i32 = arith.constant 0 : i32
    %c0_i32_0 = arith.constant 0 : i32
    %c0_i32_1 = arith.constant 0 : i32
    return %c0_i32, %c0_i32_0 : i32, i32
  }
  func.func @transform_5(%arg0: i32) -> (i32, i32) {
    %c0_i32 = arith.constant 0 : i32
    %c0_i32_0 = arith.constant 0 : i32
    return %arg0, %c0_i32 : i32, i32
  }
}

module attributes {stable_mosaic.version = 11 : i64} {
  func.func @_kernel_resident(%arg0: i32, %arg1: memref<16x128xf32, #tpu.memory_space<vmem>>, %arg2: memref<128x128xf32, #tpu.memory_space<vmem>>, %arg3: memref<1x128xf32, #tpu.memory_space<vmem>>, %arg4: memref<128x128xf32, #tpu.memory_space<vmem>>, %arg5: memref<1x128xf32, #tpu.memory_space<vmem>>, %arg6: memref<16x128xf32, #tpu.memory_space<vmem>>) attributes {dimension_semantics = [#tpu.dimension_semantics<parallel>], iteration_bounds = array<i64: 1>, scalar_prefetch = 0 : i64, scratch_operands = 0 : i64, tpu.core_type = #tpu.core_type<tc>, window_params = [{transform_indices = @transform_0, window_bounds = array<i64: 16, 128>}, {pipeline_mode = #tpu.pipeline_mode<synchronous>, transform_indices = @transform_1, window_bounds = array<i64: 128, 128>}, {pipeline_mode = #tpu.pipeline_mode<synchronous>, transform_indices = @transform_2, window_bounds = array<i64: 1, 128>}, {pipeline_mode = #tpu.pipeline_mode<synchronous>, transform_indices = @transform_3, window_bounds = array<i64: 128, 128>}, {pipeline_mode = #tpu.pipeline_mode<synchronous>, transform_indices = @transform_4, window_bounds = array<i64: 1, 128>}, {transform_indices = @transform_5, window_bounds = array<i64: 16, 128>}]} {
    %c0 = arith.constant 0 : index
    %c0_0 = arith.constant 0 : index
    %0 = vector.load %arg1[%c0, %c0_0] : memref<16x128xf32, #tpu.memory_space<vmem>>, vector<16x128xf32>
    %c0_1 = arith.constant 0 : index
    %c0_2 = arith.constant 0 : index
    %1 = vector.load %arg2[%c0_1, %c0_2] : memref<128x128xf32, #tpu.memory_space<vmem>>, vector<128x128xf32>
    %cst = arith.constant dense<0.000000e+00> : vector<16x128xf32>
    %2 = tpu.matmul %0, %1, %cst {dimension_numbers = #tpu.dot_dimension_numbers<[1], [0], [0], [1], [0, 0, 1, 1], [], []>} : vector<16x128xf32>, vector<128x128xf32>, vector<16x128xf32> -> vector<16x128xf32>
    %c0_3 = arith.constant 0 : index
    %c0_4 = arith.constant 0 : index
    %3 = vector.load %arg3[%c0_3, %c0_4] : memref<1x128xf32, #tpu.memory_space<vmem>>, vector<1x128xf32>
    %4 = vector.broadcast %3 : vector<1x128xf32> to vector<16x128xf32>
    %5 = arith.addf %2, %4 : vector<16x128xf32>
    %cst_5 = arith.constant 5.000000e-01 : f32
    %6 = vector.broadcast %cst_5 : f32 to vector<16x128xf32>
    %7 = arith.mulf %6, %5 : vector<16x128xf32>
    %cst_6 = arith.constant 0.707106769 : f32
    %8 = vector.broadcast %cst_6 : f32 to vector<16x128xf32>
    %9 = arith.mulf %5, %8 : vector<16x128xf32>
    %10 = math.erf %9 : vector<16x128xf32>
    %cst_7 = arith.constant 1.000000e+00 : f32
    %11 = vector.broadcast %cst_7 : f32 to vector<16x128xf32>
    %12 = arith.addf %11, %10 : vector<16x128xf32>
    %13 = arith.mulf %7, %12 : vector<16x128xf32>
    %c0_8 = arith.constant 0 : index
    %c0_9 = arith.constant 0 : index
    %14 = vector.load %arg4[%c0_8, %c0_9] : memref<128x128xf32, #tpu.memory_space<vmem>>, vector<128x128xf32>
    %cst_10 = arith.constant dense<0.000000e+00> : vector<16x128xf32>
    %15 = tpu.matmul %13, %14, %cst_10 {dimension_numbers = #tpu.dot_dimension_numbers<[1], [0], [0], [1], [0, 0, 1, 1], [], []>} : vector<16x128xf32>, vector<128x128xf32>, vector<16x128xf32> -> vector<16x128xf32>
    %c0_11 = arith.constant 0 : index
    %c0_12 = arith.constant 0 : index
    %16 = vector.load %arg5[%c0_11, %c0_12] : memref<1x128xf32, #tpu.memory_space<vmem>>, vector<1x128xf32>
    %17 = vector.broadcast %16 : vector<1x128xf32> to vector<16x128xf32>
    %18 = arith.addf %15, %17 : vector<16x128xf32>
    %c0_13 = arith.constant 0 : index
    %c0_14 = arith.constant 0 : index
    %19 = vector.load %arg6[%c0_13, %c0_14] : memref<16x128xf32, #tpu.memory_space<vmem>>, vector<16x128xf32>
    tpu.vector_store %arg6[%c0_13, %c0_14], %18 {strides = array<i32>} : memref<16x128xf32, #tpu.memory_space<vmem>>, vector<16x128xf32>,
    return
  }
  func.func @transform_0(%arg0: i32) -> (i32, i32) {
    %c0_i32 = arith.constant 0 : i32
    %c0_i32_0 = arith.constant 0 : i32
    return %arg0, %c0_i32 : i32, i32
  }
  func.func @transform_1(%arg0: i32) -> (i32, i32) {
    %c0_i32 = arith.constant 0 : i32
    %c0_i32_0 = arith.constant 0 : i32
    %c0_i32_1 = arith.constant 0 : i32
    return %c0_i32, %c0_i32_0 : i32, i32
  }
  func.func @transform_2(%arg0: i32) -> (i32, i32) {
    %c0_i32 = arith.constant 0 : i32
    %c0_i32_0 = arith.constant 0 : i32
    %c0_i32_1 = arith.constant 0 : i32
    return %c0_i32, %c0_i32_0 : i32, i32
  }
  func.func @transform_3(%arg0: i32) -> (i32, i32) {
    %c0_i32 = arith.constant 0 : i32
    %c0_i32_0 = arith.constant 0 : i32
    %c0_i32_1 = arith.constant 0 : i32
    return %c0_i32, %c0_i32_0 : i32, i32
  }
  func.func @transform_4(%arg0: i32) -> (i32, i32) {
    %c0_i32 = arith.constant 0 : i32
    %c0_i32_0 = arith.constant 0 : i32
    %c0_i32_1 = arith.constant 0 : i32
    return %c0_i32, %c0_i32_0 : i32, i32
  }
  func.func @transform_5(%arg0: i32) -> (i32, i32) {
    %c0_i32 = arith.constant 0 : i32
    %c0_i32_0 = arith.constant 0 : i32
    return %arg0, %c0_i32 : i32, i32
  }
}

</mosaic_0001>

<bundles_post_ra>
// kernel: tpu_custom_call.1
= control target key start
LH: loop header
LB: loop body
LE: loop exit
PB: predicated region body
PF: predicated region fallthrough
CT: control target
= control target key end

     0   :  { %10 = vsyncpa [#allocation3], 0  ;;  %s675_s0 = inlined_call_operand.hbm [shape: f32[16,128], index: 0, kind: input, shape index: {}]   ;;  %s676_s1 = inlined_call_operand.hbm [shape: f32[128,128], index: 1, kind: input, shape index: {}]   ;;  %s677_s2 = inlined_call_operand.vmem [shape: f32[1,128], index: 2, kind: input, shape index: {}]   ;;  %s678_s3 = inlined_call_operand.hbm [shape: f32[128,128], index: 3, kind: input, shape index: {}]   ;;  %s679_s4 = inlined_call_operand.vmem [shape: f32[1,128], index: 4, kind: input, shape index: {}]   ;;  %s680_s5 = inlined_call_operand.hbm [shape: f32[16,128], index: 5, kind: output, shape index: {}]  }
   0x1   :  { %11 = vsyncpa [#allocation6], 0 }
   0x2   :  { %12 = vsyncpa [#allocation4], 0  ;;  %s566_s18 = smov [#allocation5]   ;;  %s567_s20 = smov [#allocation2]  }
   0x3   :  { %s30_s19 = sshll.u32 %s566_s18, 4  ;;  %s18_s21 = sshll.u32 %s567_s20, 4  ;;  %s31_s19 = int_to_ptr.vmem [resolvable:$true] %s30_s19  ;;  %s602_s21 = int_to_ptr.vmem [resolvable:$true] %s18_s21 }
   0x4   :  { %s472_s24 = scalar_lea.hbm %s676_s1, 2048 }
   0x5   :  { %p473_p0 = scmp.ne.s32.totalorder %s676_s1, %s472_s24  ;;  %p476_p1 = scmp.lt.u32.totalorder %s472_s24, %s676_s1 }
   0x7   :  { %p478_p2 = pnand %p476_p1, %p473_p0 }
   0x9   :  { %481 = shalt.err (!%p478_p2)
}
   0xa   :  { %s482_s29 = scalar_lea.vmem %s31_s19, 2048  ;;  %p487_p4 = scmp.lt.s32.totalorder %s31_s19, %s31_s19 }
   0xb   :  { %p483_p3 = scmp.ne.s32.totalorder %s31_s19, %s482_s29  ;;  %p488_p5 = scmp.lt.s32.totalorder %s482_s29, %s482_s29 }
   0xd   :  { %p489_p6 = por %p488_p5, %p487_p4 }
   0xf   :  { %p490_p7 = pnand %p489_p6, %p483_p3 }
  0x11   :  { %493 = shalt.err (!%p490_p7)
}
  0x12   :  { %s568_s30 = smov 128   ;;  %s569_s6 = smov 8  }
  0x13   :  { %36 = dma.hbm_to_vmem [thread:$0]  %s676_s1, 2048, %s31_s19, [#allocation6], %s568_s30, %s568_s30, %s569_s6  }
  0x14   :  { %s494_s11 = scalar_lea.hbm %s675_s0, 256 }
  0x15   :  { %p495_p8 = scmp.ne.s32.totalorder %s675_s0, %s494_s11  ;;  %p498_p9 = scmp.lt.u32.totalorder %s494_s11, %s675_s0 }
  0x17   :  { %p500_p10 = pnand %p498_p9, %p495_p8 }
  0x19   :  { %503 = shalt.err (!%p500_p10)
}
  0x1a   :  { %s504_s16 = scalar_lea.vmem %s602_s21, 256  ;;  %p509_p12 = scmp.lt.s32.totalorder %s602_s21, %s602_s21 }
  0x1b   :  { %p505_p11 = scmp.ne.s32.totalorder %s602_s21, %s504_s16  ;;  %p510_p13 = scmp.lt.s32.totalorder %s504_s16, %s504_s16 }
  0x1d   :  { %p511_p0 = por %p510_p13, %p509_p12 }
  0x1f   :  { %p512_p1 = pnand %p511_p0, %p505_p11 }
  0x21   :  { %515 = shalt.err (!%p512_p1)
}
  0x22   :  { %24 = dma.hbm_to_vmem [thread:$0]  %s675_s0, 256, %s602_s21, [#allocation3], %s568_s30, %s568_s30, %s569_s6  }
  0x23   :  { %s570_s18 = smov [#allocation7]   ;;  %s516_s23 = scalar_lea.hbm %s678_s3, 2048 }
  0x24   :  { %s44_s19 = sshll.u32 %s570_s18, 4  ;;  %p517_p2 = scmp.ne.s32.totalorder %s678_s3, %s516_s23  ;;  %s45_s19 = int_to_ptr.vmem [resolvable:$true] %s44_s19 }
  0x25   :  { %p520_p3 = scmp.lt.u32.totalorder %s516_s23, %s678_s3 }
  0x27   :  { %p522_p4 = pnand %p520_p3, %p517_p2 }
  0x29   :  { %525 = shalt.err (!%p522_p4)
}
  0x2a   :  { %s526_s28 = scalar_lea.vmem %s45_s19, 2048  ;;  %p531_p6 = scmp.lt.s32.totalorder %s45_s19, %s45_s19 }
  0x2b   :  { %p527_p5 = scmp.ne.s32.totalorder %s45_s19, %s526_s28  ;;  %p532_p7 = scmp.lt.s32.totalorder %s526_s28, %s526_s28 }
  0x2d   :  { %p533_p8 = por %p532_p7, %p531_p6 }
  0x2f   :  { %p534_p9 = pnand %p533_p8, %p527_p5 }
  0x31   :  { %537 = shalt.err (!%p534_p9)
}
  0x32   :  { %50 = dma.hbm_to_vmem [thread:$0]  %s678_s3, 2048, %s45_s19, [#allocation6], %s568_s30, %s568_s30, %s569_s6  }
  0x33   :  { %560 = dma.done.wait [#allocation3], 256  }
  0x34   :  { %561 = vsyncadd [#allocation3], 4294967040 }
  0x35   :  { %562 = dma.done.wait [#allocation6], 4096  }
  0x36   :  { %563 = vsyncadd [#allocation6], 4294963200  ;;  %v64_v0 = vld [vmem:[#allocation5] sm:$0xff]  ;;  %v65_v1 = vld [vmem:[#allocation5 + $0x8] sm:$0xff]  ;;  %s571_s8 = smov [#allocation8]  }
  0x37   :  { %v66_v2 = vld [vmem:[#allocation5 + $0x10] sm:$0xff]  ;;  %v398_v3 = vpack.c.bf16 %v65_v1, %v64_v0  ;;  %v67_v4 = vld [vmem:[#allocation5 + $0x18] sm:$0xff]  ;;  %v68_v6 = vld [vmem:[#allocation5 + $0x20] sm:$0xff]  ;;  %s277_s9 = sshll.u32 %s571_s8, 4  ;;  %s278_s9 = int_to_ptr.vmem [resolvable:$true] %s277_s9 }
  0x38   :  { %v402_v5 = vpack.c.bf16 %v67_v4, %v66_v2  ;;  %v69_v7 = vld [vmem:[#allocation5 + $0x28] sm:$0xff]  ;;  %v70_v9 = vld [vmem:[#allocation5 + $0x30] sm:$0xff]  ;;  %v71_v10 = vld [vmem:[#allocation5 + $0x38] sm:$0xff]  ;;  %s538_s10 = scalar_lea.vmem %s278_s9, 256  ;;  %p543_p11 = scmp.lt.s32.totalorder %s278_s9, %s278_s9 }
  0x39   :  { %399 = vmatprep.subr.bf16.mxu0 %v398_v3  ;;  %v406_v8 = vpack.c.bf16 %v69_v7, %v68_v6  ;;  %v62_v11 = vld [vmem:[#allocation2] sm:$0xff]  ;;  %v172_v12 = vld [vmem:[#allocation7] sm:$0xff]  ;;  %v173_v13 = vld [vmem:[#allocation7 + $0x8] sm:$0xff]  ;;  %v410_v20 = vpack.c.bf16 %v71_v10, %v70_v9  ;;  %p539_p10 = scmp.ne.s32.totalorder %s278_s9, %s538_s10  ;;  %p544_p12 = scmp.lt.s32.totalorder %s538_s10, %s538_s10 }
  0x3a   :  { %401 = vmatpush3.bf16.msra.mxu0 %v398_v3  ;;  %360 = vmatprep.mubr.f32.mxu0 %v62_v11  ;;  %v174_v14 = vld [vmem:[#allocation7 + $0x10] sm:$0xff]  ;;  %v430_v15 = vpack.c.bf16 %v173_v13, %v172_v12  ;;  %v175_v16 = vld [vmem:[#allocation7 + $0x18] sm:$0xff]  ;;  %v176_v18 = vld [vmem:[#allocation7 + $0x20] sm:$0xff] }
  0x3b   :  { %403 = vmatprep.subr.bf16.mxu0 %v402_v5  ;;  %v434_v17 = vpack.c.bf16 %v175_v16, %v174_v14  ;;  %v177_v19 = vld [vmem:[#allocation7 + $0x28] sm:$0xff]  ;;  %v72_v21 = vld [vmem:[#allocation5 + $0x40] sm:$0xff]  ;;  %v74_v25 = vld [vmem:[#allocation5 + $0x50] sm:$0xff]  ;;  %p545_p13 = por %p544_p12, %p543_p11 }
  0x3c   :  { %431 = vmatprep.subr.bf16.mxu1 %v430_v15  ;;  %v73_v22 = vld [vmem:[#allocation5 + $0x48] sm:$0xff]  ;;  %v438_v23 = vpack.c.bf16 %v177_v19, %v176_v18  ;;  %v75_v26 = vld [vmem:[#allocation5 + $0x58] sm:$0xff]  ;;  %v76_v28 = vld [vmem:[#allocation5 + $0x60] sm:$0xff] }
  0x3d   :  { %433 = vmatpush3.bf16.msra.mxu1 %v430_v15  ;;  %v414_v24 = vpack.c.bf16 %v73_v22, %v72_v21  ;;  %v418_v27 = vpack.c.bf16 %v75_v26, %v74_v25  ;;  %v77_v29 = vld [vmem:[#allocation5 + $0x68] sm:$0xff]  ;;  %v78_v31 = vld [vmem:[#allocation5 + $0x70] sm:$0xff]  ;;  %v79_v32 = vld [vmem:[#allocation5 + $0x78] sm:$0xff]  ;;  %p546_p0 = pnand %p545_p13, %p539_p10 }
  0x3e   :  { %405 = vmatpush3.bf16.msra.mxu0 %v402_v5  ;;  %435 = vmatprep.subr.bf16.mxu1 %v434_v17  ;;  %v422_v30 = vpack.c.bf16 %v77_v29, %v76_v28  ;;  %v426_v33 = vpack.c.bf16 %v79_v32, %v78_v31  ;;  %v63_v34 = vld [vmem:[#allocation2 + $0x8] sm:$0xff]  ;;  %v178_v35 = vld [vmem:[#allocation7 + $0x30] sm:$0xff]  ;;  %v180_v38 = vld [vmem:[#allocation7 + $0x40] sm:$0xff] }
  0x3f   :  { %407 = vmatprep.subr.bf16.mxu0 %v406_v8  ;;  %v179_v36 = vld [vmem:[#allocation7 + $0x38] sm:$0xff]  ;;  %v181_v39 = vld [vmem:[#allocation7 + $0x48] sm:$0xff]  ;;  %v182_v41 = vld [vmem:[#allocation7 + $0x50] sm:$0xff] }
  0x40   :  { %v442_v37 = vpack.c.bf16 %v179_v36, %v178_v35  ;;  %v446_v40 = vpack.c.bf16 %v181_v39, %v180_v38  ;;  %v183_v42 = vld [vmem:[#allocation7 + $0x58] sm:$0xff]  ;;  %v184_v44 = vld [vmem:[#allocation7 + $0x60] sm:$0xff]  ;;  %v185_v45 = vld [vmem:[#allocation7 + $0x68] sm:$0xff] }
  0x41   :  { %437 = vmatpush3.bf16.msra.mxu1 %v434_v17  ;;  %v450_v43 = vpack.c.bf16 %v183_v42, %v182_v41  ;;  %v454_v46 = vpack.c.bf16 %v185_v45, %v184_v44  ;;  %v186_v47 = vld [vmem:[#allocation7 + $0x70] sm:$0xff]  ;;  %v187_v48 = vld [vmem:[#allocation7 + $0x78] sm:$0xff] }
  0x42   :  { %409 = vmatpush3.bf16.msra.mxu0 %v406_v8  ;;  %439 = vmatprep.subr.bf16.mxu1 %v438_v23  ;;  %v458_v49 = vpack.c.bf16 %v187_v48, %v186_v47  ;;  %v290_v50 = vld [vmem:[%s677_s2] ss:$0 sm:$0xff] }
  0x43   :  { %411 = vmatprep.subr.bf16.mxu0 %v410_v20  ;;  %v291_v1 = vld [vmem:[%s679_s4] ss:$0 sm:$0xff] }
  0x45   :  { %441 = vmatpush3.bf16.msra.mxu1 %v438_v23 }
  0x46   :  { %413 = vmatpush3.bf16.msra.mxu0 %v410_v20  ;;  %443 = vmatprep.subr.bf16.mxu1 %v442_v37 }
  0x47   :  { %415 = vmatprep.subr.bf16.mxu0 %v414_v24 }
  0x49   :  { %445 = vmatpush3.bf16.msra.mxu1 %v442_v37 }
  0x4a   :  { %417 = vmatpush3.bf16.msra.mxu0 %v414_v24  ;;  %447 = vmatprep.subr.bf16.mxu1 %v446_v40 }
  0x4b   :  { %419 = vmatprep.subr.bf16.mxu0 %v418_v27 }
  0x4d   :  { %449 = vmatpush3.bf16.msra.mxu1 %v446_v40 }
  0x4e   :  { %421 = vmatpush3.bf16.msra.mxu0 %v418_v27  ;;  %451 = vmatprep.subr.bf16.mxu1 %v450_v43 }
  0x4f   :  { %423 = vmatprep.subr.bf16.mxu0 %v422_v30 }
  0x51   :  { %453 = vmatpush3.bf16.msra.mxu1 %v450_v43 }
  0x52   :  { %425 = vmatpush3.bf16.msra.mxu0 %v422_v30  ;;  %455 = vmatprep.subr.bf16.mxu1 %v454_v46 }
  0x53   :  { %427 = vmatprep.subr.bf16.mxu0 %v426_v33 }
  0x55   :  { %457 = vmatpush3.bf16.msra.mxu1 %v454_v46 }
  0x56   :  { %429 = vmatpush3.bf16.msra.mxu0 %v426_v33  ;;  %459 = vmatprep.subr.bf16.mxu1 %v458_v49 }
  0x59   :  { %361 = vmatmul.mubr.f32.vlgmr.msra.gmra.mrb[0].mxu0 %v63_v34  ;;  %461 = vmatpush3.bf16.msra.mxu1 %v458_v49 }
 0x12c   :  { %v362_v51 = vpop.f32.mrb[0].mxu0 }
 0x12d   :  { %v159_v52 = vadd.f32 %v362_v51, %v290_v50  ;;  %v153_v53 = vpop.f32.mrb[1].mxu0 }
 0x12e   :  { %v154_v54 = vadd.f32 %v290_v50, %v153_v53 }
 0x12f   :  { %v165_v55 = vmul.f32 0.70710677, %v159_v52  ;;  %v163_v62 = vmul.f32 0.5, %v159_v52 }
 0x130   :  { %v164_v56 = vmul.f32 0.70710677, %v154_v54  ;;  %v162_v60 = vmul.f32 0.5, %v154_v54 }
 0x131   :  { %468 = verf.f32 %v165_v55 }
 0x132   :  { %470 = verf.f32 %v164_v56 }
 0x13b   :  { %v469_v57 = vpop.eup %468 }
 0x13c   :  { %v471_v58 = vpop.eup %470  ;;  %v169_v59 = vadd.f32 1.0, %v469_v57 }
 0x13d   :  { %v168_v61 = vadd.f32 1.0, %v471_v58 }
 0x13e   :  { %v171_v0 = vmul.f32 %v169_v59, %v163_v62 }
 0x13f   :  { %v170_v63 = vmul.f32 %v168_v61, %v162_v60 }
 0x141   :  { %395 = vmatprep.mubr.f32.mxu1 %v170_v63 }
 0x142   :  { %396 = vmatmul.mubr.f32.vlgmr.msra.gmra.mrb[0].mxu1 %v171_v0 }
 0x215   :  { %v397_v2 = vpop.f32.mrb[0].mxu1 }
 0x216   :  { %v267_v3 = vadd.f32 %v397_v2, %v291_v1  ;;  %v261_v4 = vpop.f32.mrb[1].mxu1 }
 0x217   :  { %v262_v5 = vadd.f32 %v291_v1, %v261_v4 }
 0x218   :  { %271 = vst [vmem:[#allocation8 + $0x8] sm:$0xff] %v267_v3 }
 0x219   :  { %270 = vst [vmem:[#allocation8] sm:$0xff] %v262_v5 }
 0x21a   :  { %549 = shalt.err (!%p546_p0)
}
 0x21b   :  { %s550_s4 = scalar_lea.hbm %s680_s5, 256 }
 0x21c   :  { %p551_p1 = scmp.ne.s32.totalorder %s680_s5, %s550_s4  ;;  %p554_p2 = scmp.lt.u32.totalorder %s550_s4, %s680_s5 }
 0x21e   :  { %p556_p3 = pnand %p554_p2, %p551_p1 }
 0x220   :  { %559 = shalt.err (!%p556_p3)
}
 0x221   :  { %283 = dma.vmem_to_hbm [thread:$0]  %s278_s9, 256, %s680_s5, [#allocation4], %s568_s30, %s568_s30, %s569_s6  }
 0x222   :  { %564 = dma.done.wait [#allocation4], 256  }
 0x223   :  { %565 = vsyncadd [#allocation4], 4294967040 }
 0x224   :  { %287 = vsyncpa [#allocation3], 1 }
 0x225   :  { %288 = vsyncpa [#allocation6], 1 }
 0x226   :  { %289 = vsyncpa [#allocation4], 1 }

// kernel: tpu_custom_call.1
= control target key start
LH: loop header
LB: loop body
LE: loop exit
PB: predicated region body
PF: predicated region fallthrough
CT: control target
= control target key end

     0   :  { %10 = vsyncpa [#allocation3], 0  ;;  %s675_s0 = inlined_call_operand.hbm [shape: f32[16,128], index: 0, kind: input, shape index: {}]   ;;  %s676_s1 = inlined_call_operand.hbm [shape: f32[128,128], index: 1, kind: input, shape index: {}]   ;;  %s677_s2 = inlined_call_operand.vmem [shape: f32[1,128], index: 2, kind: input, shape index: {}]   ;;  %s678_s3 = inlined_call_operand.hbm [shape: f32[128,128], index: 3, kind: input, shape index: {}]   ;;  %s679_s4 = inlined_call_operand.vmem [shape: f32[1,128], index: 4, kind: input, shape index: {}]   ;;  %s680_s5 = inlined_call_operand.hbm [shape: f32[16,128], index: 5, kind: output, shape index: {}]  }
   0x1   :  { %11 = vsyncpa [#allocation6], 0 }
   0x2   :  { %12 = vsyncpa [#allocation4], 0  ;;  %s566_s18 = smov [#allocation5]   ;;  %s567_s20 = smov [#allocation2]  }
   0x3   :  { %s30_s19 = sshll.u32 %s566_s18, 4  ;;  %s18_s21 = sshll.u32 %s567_s20, 4  ;;  %s31_s19 = int_to_ptr.vmem [resolvable:$true] %s30_s19  ;;  %s602_s21 = int_to_ptr.vmem [resolvable:$true] %s18_s21 }
   0x4   :  { %s472_s24 = scalar_lea.hbm %s676_s1, 2048 }
   0x5   :  { %p473_p0 = scmp.ne.s32.totalorder %s676_s1, %s472_s24  ;;  %p476_p1 = scmp.lt.u32.totalorder %s472_s24, %s676_s1 }
   0x7   :  { %p478_p2 = pnand %p476_p1, %p473_p0 }
   0x9   :  { %481 = shalt.err (!%p478_p2)
}
   0xa   :  { %s482_s29 = scalar_lea.vmem %s31_s19, 2048  ;;  %p487_p4 = scmp.lt.s32.totalorder %s31_s19, %s31_s19 }
   0xb   :  { %p483_p3 = scmp.ne.s32.totalorder %s31_s19, %s482_s29  ;;  %p488_p5 = scmp.lt.s32.totalorder %s482_s29, %s482_s29 }
   0xd   :  { %p489_p6 = por %p488_p5, %p487_p4 }
   0xf   :  { %p490_p7 = pnand %p489_p6, %p483_p3 }
  0x11   :  { %493 = shalt.err (!%p490_p7)
}
  0x12   :  { %s568_s30 = smov 128   ;;  %s569_s6 = smov 8  }
  0x13   :  { %36 = dma.hbm_to_vmem [thread:$0]  %s676_s1, 2048, %s31_s19, [#allocation6], %s568_s30, %s568_s30, %s569_s6  }
  0x14   :  { %s494_s11 = scalar_lea.hbm %s675_s0, 256 }
  0x15   :  { %p495_p8 = scmp.ne.s32.totalorder %s675_s0, %s494_s11  ;;  %p498_p9 = scmp.lt.u32.totalorder %s494_s11, %s675_s0 }
  0x17   :  { %p500_p10 = pnand %p498_p9, %p495_p8 }
  0x19   :  { %503 = shalt.err (!%p500_p10)
}
  0x1a   :  { %s504_s16 = scalar_lea.vmem %s602_s21, 256  ;;  %p509_p12 = scmp.lt.s32.totalorder %s602_s21, %s602_s21 }
  0x1b   :  { %p505_p11 = scmp.ne.s32.totalorder %s602_s21, %s504_s16  ;;  %p510_p13 = scmp.lt.s32.totalorder %s504_s16, %s504_s16 }
  0x1d   :  { %p511_p0 = por %p510_p13, %p509_p12 }
  0x1f   :  { %p512_p1 = pnand %p511_p0, %p505_p11 }
  0x21   :  { %515 = shalt.err (!%p512_p1)
}
  0x22   :  { %24 = dma.hbm_to_vmem [thread:$0]  %s675_s0, 256, %s602_s21, [#allocation3], %s568_s30, %s568_s30, %s569_s6  }
  0x23   :  { %s570_s18 = smov [#allocation7]   ;;  %s516_s23 = scalar_lea.hbm %s678_s3, 2048 }
  0x24   :  { %s44_s19 = sshll.u32 %s570_s18, 4  ;;  %p517_p2 = scmp.ne.s32.totalorder %s678_s3, %s516_s23  ;;  %s45_s19 = int_to_ptr.vmem [resolvable:$true] %s44_s19 }
  0x25   :  { %p520_p3 = scmp.lt.u32.totalorder %s516_s23, %s678_s3 }
  0x27   :  { %p522_p4 = pnand %p520_p3, %p517_p2 }
  0x29   :  { %525 = shalt.err (!%p522_p4)
}
  0x2a   :  { %s526_s28 = scalar_lea.vmem %s45_s19, 2048  ;;  %p531_p6 = scmp.lt.s32.totalorder %s45_s19, %s45_s19 }
  0x2b   :  { %p527_p5 = scmp.ne.s32.totalorder %s45_s19, %s526_s28  ;;  %p532_p7 = scmp.lt.s32.totalorder %s526_s28, %s526_s28 }
  0x2d   :  { %p533_p8 = por %p532_p7, %p531_p6 }
  0x2f   :  { %p534_p9 = pnand %p533_p8, %p527_p5 }
  0x31   :  { %537 = shalt.err (!%p534_p9)
}
  0x32   :  { %50 = dma.hbm_to_vmem [thread:$0]  %s678_s3, 2048, %s45_s19, [#allocation6], %s568_s30, %s568_s30, %s569_s6  }
  0x33   :  { %560 = dma.done.wait [#allocation3], 256  }
  0x34   :  { %561 = vsyncadd [#allocation3], 4294967040 }
  0x35   :  { %562 = dma.done.wait [#allocation6], 4096  }
  0x36   :  { %563 = vsyncadd [#allocation6], 4294963200  ;;  %v64_v0 = vld [vmem:[#allocation5] sm:$0xff]  ;;  %v65_v1 = vld [vmem:[#allocation5 + $0x8] sm:$0xff]  ;;  %s571_s8 = smov [#allocation8]  }
  0x37   :  { %v66_v2 = vld [vmem:[#allocation5 + $0x10] sm:$0xff]  ;;  %v398_v3 = vpack.c.bf16 %v65_v1, %v64_v0  ;;  %v67_v4 = vld [vmem:[#allocation5 + $0x18] sm:$0xff]  ;;  %v68_v6 = vld [vmem:[#allocation5 + $0x20] sm:$0xff]  ;;  %s277_s9 = sshll.u32 %s571_s8, 4  ;;  %s278_s9 = int_to_ptr.vmem [resolvable:$true] %s277_s9 }
  0x38   :  { %v402_v5 = vpack.c.bf16 %v67_v4, %v66_v2  ;;  %v69_v7 = vld [vmem:[#allocation5 + $0x28] sm:$0xff]  ;;  %v70_v9 = vld [vmem:[#allocation5 + $0x30] sm:$0xff]  ;;  %v71_v10 = vld [vmem:[#allocation5 + $0x38] sm:$0xff]  ;;  %s538_s10 = scalar_lea.vmem %s278_s9, 256  ;;  %p543_p11 = scmp.lt.s32.totalorder %s278_s9, %s278_s9 }
  0x39   :  { %399 = vmatprep.subr.bf16.mxu0 %v398_v3  ;;  %v406_v8 = vpack.c.bf16 %v69_v7, %v68_v6  ;;  %v62_v11 = vld [vmem:[#allocation2] sm:$0xff]  ;;  %v172_v12 = vld [vmem:[#allocation7] sm:$0xff]  ;;  %v173_v13 = vld [vmem:[#allocation7 + $0x8] sm:$0xff]  ;;  %v410_v20 = vpack.c.bf16 %v71_v10, %v70_v9  ;;  %p539_p10 = scmp.ne.s32.totalorder %s278_s9, %s538_s10  ;;  %p544_p12 = scmp.lt.s32.totalorder %s538_s10, %s538_s10 }
  0x3a   :  { %401 = vmatpush3.bf16.msra.mxu0 %v398_v3  ;;  %360 = vmatprep.mubr.f32.mxu0 %v62_v11  ;;  %v174_v14 = vld [vmem:[#allocation7 + $0x10] sm:$0xff]  ;;  %v430_v15 = vpack.c.bf16 %v173_v13, %v172_v12  ;;  %v175_v16 = vld [vmem:[#allocation7 + $0x18] sm:$0xff]  ;;  %v176_v18 = vld [vmem:[#allocation7 + $0x20] sm:$0xff] }
  0x3b   :  { %403 = vmatprep.subr.bf16.mxu0 %v402_v5  ;;  %v434_v17 = vpack.c.bf16 %v175_v16, %v174_v14  ;;  %v177_v19 = vld [vmem:[#allocation7 + $0x28] sm:$0xff]  ;;  %v72_v21 = vld [vmem:[#allocation5 + $0x40] sm:$0xff]  ;;  %v74_v25 = vld [vmem:[#allocation5 + $0x50] sm:$0xff]  ;;  %p545_p13 = por %p544_p12, %p543_p11 }
  0x3c   :  { %431 = vmatprep.subr.bf16.mxu1 %v430_v15  ;;  %v73_v22 = vld [vmem:[#allocation5 + $0x48] sm:$0xff]  ;;  %v438_v23 = vpack.c.bf16 %v177_v19, %v176_v18  ;;  %v75_v26 = vld [vmem:[#allocation5 + $0x58] sm:$0xff]  ;;  %v76_v28 = vld [vmem:[#allocation5 + $0x60] sm:$0xff] }
  0x3d   :  { %433 = vmatpush3.bf16.msra.mxu1 %v430_v15  ;;  %v414_v24 = vpack.c.bf16 %v73_v22, %v72_v21  ;;  %v418_v27 = vpack.c.bf16 %v75_v26, %v74_v25  ;;  %v77_v29 = vld [vmem:[#allocation5 + $0x68] sm:$0xff]  ;;  %v78_v31 = vld [vmem:[#allocation5 + $0x70] sm:$0xff]  ;;  %v79_v32 = vld [vmem:[#allocation5 + $0x78] sm:$0xff]  ;;  %p546_p0 = pnand %p545_p13, %p539_p10 }
  0x3e   :  { %405 = vmatpush3.bf16.msra.mxu0 %v402_v5  ;;  %435 = vmatprep.subr.bf16.mxu1 %v434_v17  ;;  %v422_v30 = vpack.c.bf16 %v77_v29, %v76_v28  ;;  %v426_v33 = vpack.c.bf16 %v79_v32, %v78_v31  ;;  %v63_v34 = vld [vmem:[#allocation2 + $0x8] sm:$0xff]  ;;  %v178_v35 = vld [vmem:[#allocation7 + $0x30] sm:$0xff]  ;;  %v180_v38 = vld [vmem:[#allocation7 + $0x40] sm:$0xff] }
  0x3f   :  { %407 = vmatprep.subr.bf16.mxu0 %v406_v8  ;;  %v179_v36 = vld [vmem:[#allocation7 + $0x38] sm:$0xff]  ;;  %v181_v39 = vld [vmem:[#allocation7 + $0x48] sm:$0xff]  ;;  %v182_v41 = vld [vmem:[#allocation7 + $0x50] sm:$0xff] }
  0x40   :  { %v442_v37 = vpack.c.bf16 %v179_v36, %v178_v35  ;;  %v446_v40 = vpack.c.bf16 %v181_v39, %v180_v38  ;;  %v183_v42 = vld [vmem:[#allocation7 + $0x58] sm:$0xff]  ;;  %v184_v44 = vld [vmem:[#allocation7 + $0x60] sm:$0xff]  ;;  %v185_v45 = vld [vmem:[#allocation7 + $0x68] sm:$0xff] }
  0x41   :  { %437 = vmatpush3.bf16.msra.mxu1 %v434_v17  ;;  %v450_v43 = vpack.c.bf16 %v183_v42, %v182_v41  ;;  %v454_v46 = vpack.c.bf16 %v185_v45, %v184_v44  ;;  %v186_v47 = vld [vmem:[#allocation7 + $0x70] sm:$0xff]  ;;  %v187_v48 = vld [vmem:[#allocation7 + $0x78] sm:$0xff] }
  0x42   :  { %409 = vmatpush3.bf16.msra.mxu0 %v406_v8  ;;  %439 = vmatprep.subr.bf16.mxu1 %v438_v23  ;;  %v458_v49 = vpack.c.bf16 %v187_v48, %v186_v47  ;;  %v290_v50 = vld [vmem:[%s677_s2] ss:$0 sm:$0xff] }
  0x43   :  { %411 = vmatprep.subr.bf16.mxu0 %v410_v20  ;;  %v291_v1 = vld [vmem:[%s679_s4] ss:$0 sm:$0xff] }
  0x45   :  { %441 = vmatpush3.bf16.msra.mxu1 %v438_v23 }
  0x46   :  { %413 = vmatpush3.bf16.msra.mxu0 %v410_v20  ;;  %443 = vmatprep.subr.bf16.mxu1 %v442_v37 }
  0x47   :  { %415 = vmatprep.subr.bf16.mxu0 %v414_v24 }
  0x49   :  { %445 = vmatpush3.bf16.msra.mxu1 %v442_v37 }
  0x4a   :  { %417 = vmatpush3.bf16.msra.mxu0 %v414_v24  ;;  %447 = vmatprep.subr.bf16.mxu1 %v446_v40 }
  0x4b   :  { %419 = vmatprep.subr.bf16.mxu0 %v418_v27 }
  0x4d   :  { %449 = vmatpush3.bf16.msra.mxu1 %v446_v40 }
  0x4e   :  { %421 = vmatpush3.bf16.msra.mxu0 %v418_v27  ;;  %451 = vmatprep.subr.bf16.mxu1 %v450_v43 }
  0x4f   :  { %423 = vmatprep.subr.bf16.mxu0 %v422_v30 }
  0x51   :  { %453 = vmatpush3.bf16.msra.mxu1 %v450_v43 }
  0x52   :  { %425 = vmatpush3.bf16.msra.mxu0 %v422_v30  ;;  %455 = vmatprep.subr.bf16.mxu1 %v454_v46 }
  0x53   :  { %427 = vmatprep.subr.bf16.mxu0 %v426_v33 }
  0x55   :  { %457 = vmatpush3.bf16.msra.mxu1 %v454_v46 }
  0x56   :  { %429 = vmatpush3.bf16.msra.mxu0 %v426_v33  ;;  %459 = vmatprep.subr.bf16.mxu1 %v458_v49 }
  0x59   :  { %361 = vmatmul.mubr.f32.vlgmr.msra.gmra.mrb[0].mxu0 %v63_v34  ;;  %461 = vmatpush3.bf16.msra.mxu1 %v458_v49 }
 0x12c   :  { %v362_v51 = vpop.f32.mrb[0].mxu0 }
 0x12d   :  { %v159_v52 = vadd.f32 %v362_v51, %v290_v50  ;;  %v153_v53 = vpop.f32.mrb[1].mxu0 }
 0x12e   :  { %v154_v54 = vadd.f32 %v290_v50, %v153_v53 }
 0x12f   :  { %v165_v55 = vmul.f32 0.70710677, %v159_v52  ;;  %v163_v62 = vmul.f32 0.5, %v159_v52 }
 0x130   :  { %v164_v56 = vmul.f32 0.70710677, %v154_v54  ;;  %v162_v60 = vmul.f32 0.5, %v154_v54 }
 0x131   :  { %468 = verf.f32 %v165_v55 }
 0x132   :  { %470 = verf.f32 %v164_v56 }
 0x13b   :  { %v469_v57 = vpop.eup %468 }
 0x13c   :  { %v471_v58 = vpop.eup %470  ;;  %v169_v59 = vadd.f32 1.0, %v469_v57 }
 0x13d   :  { %v168_v61 = vadd.f32 1.0, %v471_v58 }
 0x13e   :  { %v171_v0 = vmul.f32 %v169_v59, %v163_v62 }
 0x13f   :  { %v170_v63 = vmul.f32 %v168_v61, %v162_v60 }
 0x141   :  { %395 = vmatprep.mubr.f32.mxu1 %v170_v63 }
 0x142   :  { %396 = vmatmul.mubr.f32.vlgmr.msra.gmra.mrb[0].mxu1 %v171_v0 }
 0x215   :  { %v397_v2 = vpop.f32.mrb[0].mxu1 }
 0x216   :  { %v267_v3 = vadd.f32 %v397_v2, %v291_v1  ;;  %v261_v4 = vpop.f32.mrb[1].mxu1 }
 0x217   :  { %v262_v5 = vadd.f32 %v291_v1, %v261_v4 }
 0x218   :  { %271 = vst [vmem:[#allocation8 + $0x8] sm:$0xff] %v267_v3 }
 0x219   :  { %270 = vst [vmem:[#allocation8] sm:$0xff] %v262_v5 }
 0x21a   :  { %549 = shalt.err (!%p546_p0)
}
 0x21b   :  { %s550_s4 = scalar_lea.hbm %s680_s5, 256 }
 0x21c   :  { %p551_p1 = scmp.ne.s32.totalorder %s680_s5, %s550_s4  ;;  %p554_p2 = scmp.lt.u32.totalorder %s550_s4, %s680_s5 }
 0x21e   :  { %p556_p3 = pnand %p554_p2, %p551_p1 }
 0x220   :  { %559 = shalt.err (!%p556_p3)
}
 0x221   :  { %283 = dma.vmem_to_hbm [thread:$0]  %s278_s9, 256, %s680_s5, [#allocation4], %s568_s30, %s568_s30, %s569_s6  }
 0x222   :  { %564 = dma.done.wait [#allocation4], 256  }
 0x223   :  { %565 = vsyncadd [#allocation4], 4294967040 }
 0x224   :  { %287 = vsyncpa [#allocation3], 1 }
 0x225   :  { %288 = vsyncpa [#allocation6], 1 }
 0x226   :  { %289 = vsyncpa [#allocation4], 1 }

</bundles_post_ra>
